<compile_context>
chip_gen: v6e
topology: v6e:2x2x1
jax: 0.10.0
libtpu: 0.0.40
codegen_flags: <defaults>
</compile_context>

<pallas_src>
import functools

import jax
import jax.numpy as jnp
from jax.experimental import pallas as pl
from jax.experimental.pallas import tpu as pltpu


def _round_up(x, m):
    return (x + m - 1) // m * m


def _softmax_last(x):
    """Row softmax in f32; divide moved to the EUP via approximate reciprocal."""
    m = jnp.max(x, axis=-1, keepdims=True)
    e = jnp.exp(x - m)
    return e * pl.reciprocal(jnp.sum(e, axis=-1, keepdims=True), approx=True)


def _maa_kernel(q_ref, docs_ref, mem_ref, wq_ref, bq_ref, wk_ref, bk_ref,
                out_ref, qm_ref, acc_ref, *, doc_len, lambda_factor):
    """One grid step == (batch b, doc n); docs are pipelined along n."""
    n = pl.program_id(1)

    # Per-batch init: query projection + memory enrichment (cached in scratch),
    # zero the f32 accumulator.
    @pl.when(n == 0)
    def _():
        q16 = q_ref[0].astype(jnp.bfloat16)                        # (Qp, Ep)
        qt = jnp.dot(q16, wq_ref[...],                              # bf16 MXU
                     preferred_element_type=jnp.float32)
        qm_ref[...] = qt + bq_ref[...] + mem_ref[0]
        acc_ref[...] = jnp.zeros_like(acc_ref)

    # This doc's indexed||hypothetical rows, stacked along doc_len: (2L, Ep).
    docs = docs_ref[0, 0]                                           # bf16

    # Fused key projection for both halves: one (2L,Ep)@(Ep,Ep) MXU matmul.
    k = jnp.dot(docs, wk_ref[...],
                preferred_element_type=jnp.float32) + bk_ref[...]   # (2L, Ep) f32

    # Scores for both halves in one matmul; contract on the embed dim directly
    # (no explicit transpose of k).
    qm16 = qm_ref[...].astype(jnp.bfloat16)
    s = jax.lax.dot_general(qm16, k.astype(jnp.bfloat16),
                            dimension_numbers=(((1,), (1,)), ((), ())),
                            preferred_element_type=jnp.float32)     # (Qp, 2L)

    s_i = _softmax_last(s[:, :doc_len])
    s_h = _softmax_last(s[:, doc_len:])
    s_comb = (lambda_factor * s_h + s_i).astype(jnp.bfloat16)       # (Qp, L)

    # augmented_docs = cat([indexed, hypothetical]); the shared score block hits
    # both halves, so apply it once to (indexed + hypothetical).
    vals = docs[:doc_len] + docs[doc_len:]                          # (L, Ep) bf16

    acc_ref[...] += jnp.dot(s_comb, vals, preferred_element_type=jnp.float32)

    @pl.when(n == pl.num_programs(1) - 1)
    def _():
        out_ref[0] = acc_ref[...].astype(out_ref.dtype)


def memory_augmented_attention(query, indexed_docs, hypothetical_docs,
                               memory_state, params, lambda_factor=1.0):
    B, Q, E = query.shape
    _, N, L, _ = indexed_docs.shape
    assert hypothetical_docs.shape == (B, N, L, E), (
        "the torch score addition requires num_indexed == num_hypothetical")
    assert memory_state.shape == (B, Q, E)

    Qp = _round_up(Q, 8)
    Ep = _round_up(E, 128)
    f32, bf16 = jnp.float32, jnp.bfloat16

    # Lane/sublane-dense zero padding (Q -> 8k, E -> 128k).  Zero pads do not
    # change any matmul / softmax result on the real rows/cols; padded rows and
    # cols are sliced off after the kernel.
    def pad_qe(x):
        return jnp.pad(x.astype(f32), ((0, 0), (0, Qp - Q), (0, Ep - E)))

    q_p = pad_qe(query)
    mem_p = pad_qe(memory_state)

    # Stack indexed||hypothetical along doc_len so the kernel can fuse the key
    # projection and the score matmul of both halves; cast the docs (largest
    # operand) to bf16 to halve HBM traffic (matmuls accumulate in f32).
    docs = jnp.concatenate([indexed_docs, hypothetical_docs], axis=2)  # (B,N,2L,E)
    docs_p = jnp.pad(docs.astype(f32),
                     ((0, 0), (0, 0), (0, 0), (0, Ep - E))).astype(bf16)

    # Pre-transposed (in, out) weights -> no in-kernel transpose; bf16 for MXU.
    wq_t = jnp.pad(params["wq"].T.astype(f32),
                   ((0, Ep - E), (0, Ep - E))).astype(bf16)
    wk_t = jnp.pad(params["wk"].T.astype(f32),
                   ((0, Ep - E), (0, Ep - E))).astype(bf16)
    bq_p = jnp.pad(params["bq"].astype(f32), ((0, 0), (0, Ep - E)))
    bk_p = jnp.pad(params["bk"].astype(f32), ((0, 0), (0, Ep - E)))

    kernel = functools.partial(_maa_kernel, doc_len=L,
                               lambda_factor=float(lambda_factor))

    grid_spec = pltpu.PrefetchScalarGridSpec(
        num_scalar_prefetch=0,
        grid=(B, N),                              # b: parallel, n: reduction (last)
        in_specs=[
            pl.BlockSpec((1, Qp, Ep), lambda b, n: (b, 0, 0)),           # query
            pl.BlockSpec((1, 1, 2 * L, Ep), lambda b, n: (b, n, 0, 0)),  # docs
            pl.BlockSpec((1, Qp, Ep), lambda b, n: (b, 0, 0)),           # memory
            pl.BlockSpec((Ep, Ep), lambda b, n: (0, 0)),                 # Wq^T
            pl.BlockSpec((1, Ep), lambda b, n: (0, 0)),                  # bq
            pl.BlockSpec((Ep, Ep), lambda b, n: (0, 0)),                 # Wk^T
            pl.BlockSpec((1, Ep), lambda b, n: (0, 0)),                  # bk
        ],
        out_specs=pl.BlockSpec((1, Qp, Ep), lambda b, n: (b, 0, 0)),
        scratch_shapes=[
            pltpu.VMEM((Qp, Ep), jnp.float32),   # memory-enriched query (cached)
            pltpu.VMEM((Qp, Ep), jnp.float32),   # output accumulator
        ],
    )

    # Explicit VMEM budget with headroom (scoped defaults: 16/32 MiB on v5e/v6e;
    # v7x physical VMEM is 64 MiB).
    vmem_est = (
        2 * 2 * (2 * L) * Ep * 2            # docs block, bf16, double-buffered
        + 2 * 2 * Qp * Ep * 4               # query + memory blocks, f32, 2 bufs
        + 2 * Qp * Ep * 4                   # output block
        + 2 * Ep * Ep * 2 + 2 * Ep * 4      # weights (bf16) + biases (f32)
        + 2 * Qp * Ep * 4                   # scratch (q_m, acc)
    )
    vmem_limit = int(min(60 * 1024 * 1024, max(8 * 1024 * 1024, 2 * vmem_est)))

    out_padded = pl.pallas_call(
        kernel,
        out_shape=jax.ShapeDtypeStruct((B, Qp, Ep), jnp.float32),
        grid_spec=grid_spec,
        compiler_params=pltpu.CompilerParams(
            dimension_semantics=("parallel", "arbitrary"),
            vmem_limit_bytes=vmem_limit),
    )(q_p, docs_p, mem_p, wq_t, bq_p, wk_t, bk_p)

    return out_padded[:, :Q, :E]


def reference_forward(query, indexed, hypo, memory, params, lam):
    """Pure-JAX reference with the same intended semantics and the same bf16
    matmul-input casts as the kernel (f32 accumulation, f32 softmax)."""
    f32, bf16 = jnp.float32, jnp.bfloat16
    wq_t = params["wq"].T.astype(bf16)
    wk_t = params["wk"].T.astype(bf16)
    bq, bk = params["bq"][0], params["bk"][0]

    qt = jnp.einsum("bqe,ef->bqf", query.astype(bf16), wq_t,
                    preferred_element_type=f32)
    qm = qt + bq + memory

    ind16 = indexed.astype(bf16)
    hyp16 = hypo.astype(bf16)
    k_i = jnp.einsum("bnle,ef->bnlf", ind16, wk_t, preferred_element_type=f32) + bk
    k_h = jnp.einsum("bnle,ef->bnlf", hyp16, wk_t, preferred_element_type=f32) + bk

    qm16 = qm.astype(bf16)
    s_i = jax.nn.softmax(
        jnp.einsum("bqe,bnle->bnql", qm16, k_i.astype(bf16),
                   preferred_element_type=f32), axis=-1)
    s_h = jax.nn.softmax(
        jnp.einsum("bqe,bnle->bnql", qm16, k_h.astype(bf16),
                   preferred_element_type=f32), axis=-1)
    s = (lam * s_h + s_i).astype(bf16)
    vals = ind16 + hyp16
    return jnp.einsum("bnql,bnle->bqe", s, vals, preferred_element_type=f32)


if __name__ == "__main__":
    B, Q, E = 2, 3, 5           # batch, query_len, embed_dim
    N, L = 4, 4                 # num docs (shared for indexed/hypothetical), doc_len
    lam = 1.0

    key = jax.random.PRNGKey(0)
    k_q, k_i, k_h, k_m, k_wq, k_bq, k_wk, k_bk, k_wv, k_bv = jax.random.split(key, 10)

    bound = 1.0 / (E ** 0.5)    # nn.Linear default init range
    params = {
        "wq": jax.random.uniform(k_wq, (E, E), jnp.float32, -bound, bound),
        "bq": jax.random.uniform(k_bq, (1, E), jnp.float32, -bound, bound),
        "wk": jax.random.uniform(k_wk, (E, E), jnp.float32, -bound, bound),
        "bk": jax.random.uniform(k_bk, (1, E), jnp.float32, -bound, bound),
        # value_linear is defined in the torch __init__ but never used in forward.
        "wv": jax.random.uniform(k_wv, (E, E), jnp.float32, -bound, bound),
        "bv": jax.random.uniform(k_bv, (1, E), jnp.float32, -bound, bound),
    }

    query = jax.random.normal(k_q, (B, Q, E), jnp.float32)
    indexed_docs = jax.random.normal(k_i, (B, N, L, E), jnp.float32)
    hypothetical_docs = jax.random.normal(k_h, (B, N, L, E), jnp.float32)
    memory_state = jax.random.normal(k_m, (B, Q, E), jnp.float32)

    out = memory_augmented_attention(query, indexed_docs, hypothetical_docs,
                                     memory_state, params, lambda_factor=lam)
    out = jax.block_until_ready(out)

    ref = reference_forward(query, indexed_docs, hypothetical_docs,
                            memory_state, params, lam)
    assert out.shape == (B, Q, E)
    # bf16 MXU matmuls + approximate (EUP) softmax reciprocal -> loose tolerance.
    assert jnp.allclose(out, ref, atol=5e-2, rtol=5e-2), "mismatch vs JAX reference"

    print("KERNEL_OK")
</pallas_src>

<mosaic_0001>
module attributes {stable_mosaic.version = 11 : i64} {
  func.func @_maa_kernel(%arg0: i32, %arg1: i32, %arg2: memref<1x8x128xf32, #tpu.memory_space<vmem>>, %arg3: memref<1x1x8x128xbf16, #tpu.memory_space<vmem>>, %arg4: memref<1x8x128xf32, #tpu.memory_space<vmem>>, %arg5: memref<128x128xbf16, #tpu.memory_space<vmem>>, %arg6: memref<1x128xf32, #tpu.memory_space<vmem>>, %arg7: memref<128x128xbf16, #tpu.memory_space<vmem>>, %arg8: memref<1x128xf32, #tpu.memory_space<vmem>>, %arg9: memref<1x8x128xf32, #tpu.memory_space<vmem>>, %arg10: memref<8x128xf32, #tpu.memory_space<vmem>>, %arg11: memref<8x128xf32, #tpu.memory_space<vmem>>) attributes {dimension_semantics = [#tpu.dimension_semantics<parallel>, #tpu.dimension_semantics<arbitrary>], iteration_bounds = array<i64: 2, 4>, scalar_prefetch = 0 : i64, scratch_operands = 2 : i64, tpu.core_type = #tpu.core_type<tc>, window_params = [{transform_indices = @transform_0, window_bounds = array<i64: 1, 8, 128>}, {transform_indices = @transform_1, window_bounds = array<i64: 1, 1, 8, 128>}, {transform_indices = @transform_2, window_bounds = array<i64: 1, 8, 128>}, {pipeline_mode = #tpu.pipeline_mode<synchronous>, transform_indices = @transform_3, window_bounds = array<i64: 128, 128>}, {pipeline_mode = #tpu.pipeline_mode<synchronous>, transform_indices = @transform_4, window_bounds = array<i64: 1, 128>}, {pipeline_mode = #tpu.pipeline_mode<synchronous>, transform_indices = @transform_5, window_bounds = array<i64: 128, 128>}, {pipeline_mode = #tpu.pipeline_mode<synchronous>, transform_indices = @transform_6, window_bounds = array<i64: 1, 128>}, {transform_indices = @transform_7, window_bounds = array<i64: 1, 8, 128>}]} {
    %c0_i32 = arith.constant 0 : i32
    %0 = arith.cmpi eq, %arg1, %c0_i32 : i32
    %1 = arith.extui %0 : i1 to i32
    %c0_i32_0 = arith.constant 0 : i32
    %2 = arith.cmpi ne, %1, %c0_i32_0 : i32
    scf.if %2 {
      %c0_22 = arith.constant 0 : index
      %c0_23 = arith.constant 0 : index
      %c0_24 = arith.constant 0 : index
      %50 = vector.load %arg2[%c0_22, %c0_23, %c0_24] : memref<1x8x128xf32, #tpu.memory_space<vmem>>, vector<1x8x128xf32>
      %51 = vector.shape_cast %50 : vector<1x8x128xf32> to vector<8x128xf32>
      %52 = arith.truncf %51 : vector<8x128xf32> to vector<8x128xbf16>
      %c0_25 = arith.constant 0 : index
      %c0_26 = arith.constant 0 : index
      %53 = vector.load %arg5[%c0_25, %c0_26] : memref<128x128xbf16, #tpu.memory_space<vmem>>, vector<128x128xbf16>
      %cst_27 = arith.constant dense<0.000000e+00> : vector<8x128xf32>
      %54 = tpu.matmul %52, %53, %cst_27 {dimension_numbers = #tpu.dot_dimension_numbers<[1], [0], [0], [1], [0, 0, 1, 1], [], []>} : vector<8x128xbf16>, vector<128x128xbf16>, vector<8x128xf32> -> vector<8x128xf32>
      %c0_28 = arith.constant 0 : index
      %c0_29 = arith.constant 0 : index
      %55 = vector.load %arg6[%c0_28, %c0_29] : memref<1x128xf32, #tpu.memory_space<vmem>>, vector<1x128xf32>
      %56 = vector.broadcast %55 : vector<1x128xf32> to vector<8x128xf32>
      %57 = arith.addf %54, %56 : vector<8x128xf32>
      %c0_30 = arith.constant 0 : index
      %c0_31 = arith.constant 0 : index
      %c0_32 = arith.constant 0 : index
      %58 = vector.load %arg4[%c0_30, %c0_31, %c0_32] : memref<1x8x128xf32, #tpu.memory_space<vmem>>, vector<1x8x128xf32>
      %59 = vector.shape_cast %58 : vector<1x8x128xf32> to vector<8x128xf32>
      %60 = arith.addf %57, %59 : vector<8x128xf32>
      %c0_33 = arith.constant 0 : index
      %c0_34 = arith.constant 0 : index
      %61 = vector.load %arg10[%c0_33, %c0_34] : memref<8x128xf32, #tpu.memory_space<vmem>>, vector<8x128xf32>
      tpu.vector_store %arg10[%c0_33, %c0_34], %60 {strides = array<i32>} : memref<8x128xf32, #tpu.memory_space<vmem>>, vector<8x128xf32>,
      %cst_35 = arith.constant 0.000000e+00 : f32
      %62 = vector.broadcast %cst_35 : f32 to vector<8x128xf32>
      %c0_36 = arith.constant 0 : index
      %c0_37 = arith.constant 0 : index
      %63 = vector.load %arg11[%c0_36, %c0_37] : memref<8x128xf32, #tpu.memory_space<vmem>>, vector<8x128xf32>
      tpu.vector_store %arg11[%c0_36, %c0_37], %62 {strides = array<i32>} : memref<8x128xf32, #tpu.memory_space<vmem>>, vector<8x128xf32>,
    } else {
    }
    %c0 = arith.constant 0 : index
    %c0_1 = arith.constant 0 : index
    %c0_2 = arith.constant 0 : index
    %c0_3 = arith.constant 0 : index
    %3 = vector.load %arg3[%c0, %c0_1, %c0_2, %c0_3] : memref<1x1x8x128xbf16, #tpu.memory_space<vmem>>, vector<1x1x8x128xbf16>
    %4 = vector.shape_cast %3 : vector<1x1x8x128xbf16> to vector<8x128xbf16>
    %c0_4 = arith.constant 0 : index
    %c0_5 = arith.constant 0 : index
    %5 = vector.load %arg7[%c0_4, %c0_5] : memref<128x128xbf16, #tpu.memory_space<vmem>>, vector<128x128xbf16>
    %cst = arith.constant dense<0.000000e+00> : vector<8x128xf32>
    %6 = tpu.matmul %4, %5, %cst {dimension_numbers = #tpu.dot_dimension_numbers<[1], [0], [0], [1], [0, 0, 1, 1], [], []>} : vector<8x128xbf16>, vector<128x128xbf16>, vector<8x128xf32> -> vector<8x128xf32>
    %c0_6 = arith.constant 0 : index
    %c0_7 = arith.constant 0 : index
    %7 = vector.load %arg8[%c0_6, %c0_7] : memref<1x128xf32, #tpu.memory_space<vmem>>, vector<1x128xf32>
    %8 = vector.broadcast %7 : vector<1x128xf32> to vector<8x128xf32>
    %9 = arith.addf %6, %8 : vector<8x128xf32>
    %c0_8 = arith.constant 0 : index
    %c0_9 = arith.constant 0 : index
    %10 = vector.load %arg10[%c0_8, %c0_9] : memref<8x128xf32, #tpu.memory_space<vmem>>, vector<8x128xf32>
    %11 = arith.truncf %10 : vector<8x128xf32> to vector<8x128xbf16>
    %12 = arith.truncf %9 : vector<8x128xf32> to vector<8x128xbf16>
    %cst_10 = arith.constant dense<0.000000e+00> : vector<8x8xf32>
    %13 = tpu.matmul %11, %12, %cst_10 {dimension_numbers = #tpu.dot_dimension_numbers<[1], [1], [0], [0], [0, 0, 1, 0], [], []>} : vector<8x128xbf16>, vector<8x128xbf16>, vector<8x8xf32> -> vector<8x8xf32>
    %14 = vector.extract_strided_slice %13 {offsets = [0, 0], sizes = [8, 4], strides = [1, 1]} : vector<8x8xf32> to vector<8x4xf32>
    %cst_11 = arith.constant dense<0xFF800000> : vector<8xf32>
    %15 = vector.multi_reduction <maximumf>, %14, %cst_11 [1] : vector<8x4xf32> to vector<8xf32>
    %16 = vector.shape_cast %15 : vector<8xf32> to vector<8x1xf32>
    %17 = vector.broadcast %16 : vector<8x1xf32> to vector<8x4xf32>
    %18 = arith.subf %14, %17 : vector<8x4xf32>
    %19 = math.exp %18 : vector<8x4xf32>
    %cst_12 = arith.constant dense<0.000000e+00> : vector<8xf32>
    %20 = vector.multi_reduction <add>, %19, %cst_12 [1] : vector<8x4xf32> to vector<8xf32>
    %21 = vector.shape_cast %20 : vector<8xf32> to vector<8x1xf32>
    %22 = tpu.reciprocal %21 {approx = true} : vector<8x1xf32> -> vector<8x1xf32>
    %23 = vector.broadcast %22 : vector<8x1xf32> to vector<8x4xf32>
    %24 = arith.mulf %19, %23 : vector<8x4xf32>
    %25 = vector.extract_strided_slice %13 {offsets = [0, 4], sizes = [8, 4], strides = [1, 1]} : vector<8x8xf32> to vector<8x4xf32>
    %cst_13 = arith.constant dense<0xFF800000> : vector<8xf32>
    %26 = vector.multi_reduction <maximumf>, %25, %cst_13 [1] : vector<8x4xf32> to vector<8xf32>
    %27 = vector.shape_cast %26 : vector<8xf32> to vector<8x1xf32>
    %28 = vector.broadcast %27 : vector<8x1xf32> to vector<8x4xf32>
    %29 = arith.subf %25, %28 : vector<8x4xf32>
    %30 = math.exp %29 : vector<8x4xf32>
    %cst_14 = arith.constant dense<0.000000e+00> : vector<8xf32>
    %31 = vector.multi_reduction <add>, %30, %cst_14 [1] : vector<8x4xf32> to vector<8xf32>
    %32 = vector.shape_cast %31 : vector<8xf32> to vector<8x1xf32>
    %33 = tpu.reciprocal %32 {approx = true} : vector<8x1xf32> -> vector<8x1xf32>
    %34 = vector.broadcast %33 : vector<8x1xf32> to vector<8x4xf32>
    %35 = arith.mulf %30, %34 : vector<8x4xf32>
    %cst_15 = arith.constant 1.000000e+00 : f32
    %36 = vector.broadcast %cst_15 : f32 to vector<8x4xf32>
    %37 = arith.mulf %36, %35 : vector<8x4xf32>
    %38 = arith.addf %37, %24 : vector<8x4xf32>
    %39 = arith.truncf %38 : vector<8x4xf32> to vector<8x4xbf16>
    %40 = vector.extract_strided_slice %4 {offsets = [0, 0], sizes = [4, 128], strides = [1, 1]} : vector<8x128xbf16> to vector<4x128xbf16>
    %41 = vector.extract_strided_slice %4 {offsets = [4, 0], sizes = [4, 128], strides = [1, 1]} : vector<8x128xbf16> to vector<4x128xbf16>
    %42 = arith.addf %40, %41 : vector<4x128xbf16>
    %c0_16 = arith.constant 0 : index
    %c0_17 = arith.constant 0 : index
    %43 = vector.load %arg11[%c0_16, %c0_17] : memref<8x128xf32, #tpu.memory_space<vmem>>, vector<8x128xf32>
    %cst_18 = arith.constant dense<0.000000e+00> : vector<8x128xf32>
    %44 = tpu.matmul %39, %42, %cst_18 {dimension_numbers = #tpu.dot_dimension_numbers<[1], [0], [0], [1], [0, 0, 1, 1], [], []>} : vector<8x4xbf16>, vector<4x128xbf16>, vector<8x128xf32> -> vector<8x128xf32>
    %45 = arith.addf %43, %44 : vector<8x128xf32>
    %c0_19 = arith.constant 0 : index
    %c0_20 = arith.constant 0 : index
    %46 = vector.load %arg11[%c0_19, %c0_20] : memref<8x128xf32, #tpu.memory_space<vmem>>, vector<8x128xf32>
    tpu.vector_store %arg11[%c0_19, %c0_20], %45 {strides = array<i32>} : memref<8x128xf32, #tpu.memory_space<vmem>>, vector<8x128xf32>,
    %c3_i32 = arith.constant 3 : i32
    %47 = arith.cmpi eq, %arg1, %c3_i32 : i32
    %48 = arith.extui %47 : i1 to i32
    %c0_i32_21 = arith.constant 0 : i32
    %49 = arith.cmpi ne, %48, %c0_i32_21 : i32
    scf.if %49 {
      %c0_22 = arith.constant 0 : index
      %c0_23 = arith.constant 0 : index
      %50 = vector.load %arg11[%c0_22, %c0_23] : memref<8x128xf32, #tpu.memory_space<vmem>>, vector<8x128xf32>
      %c0_24 = arith.constant 0 : index
      %c0_25 = arith.constant 0 : index
      %c0_26 = arith.constant 0 : index
      %51 = vector.load %arg9[%c0_24, %c0_25, %c0_26] : memref<1x8x128xf32, #tpu.memory_space<vmem>>, vector<1x8x128xf32>
      %52 = vector.shape_cast %51 : vector<1x8x128xf32> to vector<8x128xf32>
      %53 = vector.shape_cast %50 : vector<8x128xf32> to vector<1x8x128xf32>
      tpu.vector_store %arg9[%c0_24, %c0_25, %c0_26], %53 {strides = array<i32>} : memref<1x8x128xf32, #tpu.memory_space<vmem>>, vector<1x8x128xf32>,
    } else {
    }
    return
  }
  func.func @transform_0(%arg0: i32, %arg1: i32) -> (i32, i32, i32) {
    %c0_i32 = arith.constant 0 : i32
    %c0_i32_0 = arith.constant 0 : i32
    %c0_i32_1 = arith.constant 0 : i32
    return %arg0, %c0_i32, %c0_i32_0 : i32, i32, i32
  }
  func.func @transform_1(%arg0: i32, %arg1: i32) -> (i32, i32, i32, i32) {
    %c0_i32 = arith.constant 0 : i32
    %c0_i32_0 = arith.constant 0 : i32
    %c0_i32_1 = arith.constant 0 : i32
    return %arg0, %arg1, %c0_i32, %c0_i32_0 : i32, i32, i32, i32
  }
  func.func @transform_2(%arg0: i32, %arg1: i32) -> (i32, i32, i32) {
    %c0_i32 = arith.constant 0 : i32
    %c0_i32_0 = arith.constant 0 : i32
    %c0_i32_1 = arith.constant 0 : i32
    return %arg0, %c0_i32, %c0_i32_0 : i32, i32, i32
  }
  func.func @transform_3(%arg0: i32, %arg1: i32) -> (i32, i32) {
    %c0_i32 = arith.constant 0 : i32
    %c0_i32_0 = arith.constant 0 : i32
    %c0_i32_1 = arith.constant 0 : i32
    return %c0_i32, %c0_i32_0 : i32, i32
  }
  func.func @transform_4(%arg0: i32, %arg1: i32) -> (i32, i32) {
    %c0_i32 = arith.constant 0 : i32
    %c0_i32_0 = arith.constant 0 : i32
    %c0_i32_1 = arith.constant 0 : i32
    return %c0_i32, %c0_i32_0 : i32, i32
  }
  func.func @transform_5(%arg0: i32, %arg1: i32) -> (i32, i32) {
    %c0_i32 = arith.constant 0 : i32
    %c0_i32_0 = arith.constant 0 : i32
    %c0_i32_1 = arith.constant 0 : i32
    return %c0_i32, %c0_i32_0 : i32, i32
  }
  func.func @transform_6(%arg0: i32, %arg1: i32) -> (i32, i32) {
    %c0_i32 = arith.constant 0 : i32
    %c0_i32_0 = arith.constant 0 : i32
    %c0_i32_1 = arith.constant 0 : i32
    return %c0_i32, %c0_i32_0 : i32, i32
  }
  func.func @transform_7(%arg0: i32, %arg1: i32) -> (i32, i32, i32) {
    %c0_i32 = arith.constant 0 : i32
    %c0_i32_0 = arith.constant 0 : i32
    %c0_i32_1 = arith.constant 0 : i32
    return %arg0, %c0_i32, %c0_i32_0 : i32, i32, i32
  }
}

</mosaic_0001>

<bundles_post_ra>
// kernel: tpu_custom_call.1
= control target key start
LH: loop header
LB: loop body
LE: loop exit
PB: predicated region body
PF: predicated region fallthrough
CT: control target
= control target key end

     0   :  { %s1892_s0 = inlined_call_operand.hbm [shape: f32[2,8,128], index: 0, kind: input, shape index: {}]   ;;  %s1893_s1 = inlined_call_operand.hbm [shape: bf16[2,4,8,128], index: 1, kind: input, shape index: {}]   ;;  %s1894_s2 = inlined_call_operand.hbm [shape: f32[2,8,128], index: 2, kind: input, shape index: {}]   ;;  %s1895_s3 = inlined_call_operand.hbm [shape: bf16[128,128], index: 3, kind: input, shape index: {}]   ;;  %s1896_s4 = inlined_call_operand.vmem [shape: f32[1,128], index: 4, kind: input, shape index: {}]   ;;  %s1897_s5 = inlined_call_operand.hbm [shape: bf16[128,128], index: 5, kind: input, shape index: {}]   ;;  %s1898_s6 = inlined_call_operand.vmem [shape: f32[1,128], index: 6, kind: input, shape index: {}]   ;;  %s1899_s7 = inlined_call_operand.hbm [shape: f32[2,8,128], index: 7, kind: output, shape index: {}]  }
   0x1   :  { %1914 = sst [smem:[#allocation26_spill]] %s1892_s0 }
   0x2   :  { %1915 = sst [smem:[#allocation27_spill]] %s1893_s1 }
   0x3   :  { %1916 = sst [smem:[#allocation28_spill]] %s1895_s3 }
   0x4   :  { %1917 = sst [smem:[#allocation29_spill]] %s1896_s4 }
   0x5   :  { %1918 = sst [smem:[#allocation30_spill]] %s1897_s5 }
   0x6   :  { %1919 = sst [smem:[#allocation31_spill]] %s1898_s6 }
   0x7   :  { %1920 = sst [smem:[#allocation32_spill]] %s1899_s7 }
   0x8   :  { %12 = vsyncpa [#allocation5], 0 }
   0x9   :  { %14 = vsyncpa [#allocation5 + $0x1], 0 }
   0xa   :  { %15 = vsyncpa [#allocation8], 0 }
   0xb   :  { %17 = vsyncpa [#allocation8 + $0x1], 0 }
   0xc   :  { %18 = vsyncpa [#allocation11], 0 }
   0xd   :  { %19 = vsyncpa [#allocation6], 0 }
   0xe   :  { %21 = vsyncpa [#allocation6 + $0x1], 0  ;;  %s1553_s24 = smov 0   ;;  %s1555_s25 = smov 0  }
   0xf   :  { %s1557_s26 = smov 0   ;;  %s1559_s27 = smov 0  }
  0x10   :  { %s1561_s28 = smov 0   ;;  %s1563_s29 = smov 0  }
  0x11   :  { %s1565_s30 = smov 0   ;;  %s1567_s8 = smov 0  }
  0x12   :  { %s1569_s9 = smov 0   ;;  %s1571_s10 = smov 0  }
  0x13   :  { %s1573_s11 = smov 0  }
  0x14 LB: > { %1921 = sst [smem:[#allocation19_spill]] %s1461_s25  ;;  %s1609_s12 = sadd.s32 4294967295, %s1497_s11   ;;  %s1497_s11 = sphi %s1573_s11, %s27_s11   ;;  %s1493_s10 = sphi %s1571_s10, %s1973_s10   ;;  %s1489_s9 = sphi %s1569_s9, %s1972_s9   ;;  %s1485_s8 = sphi %s1567_s8, %s1971_s8   ;;  %s1481_s30 = sphi %s1565_s30, %s1970_s30   ;;  %s1477_s29 = sphi %s1563_s29, %s1969_s29   ;;  %s1473_s28 = sphi %s1561_s28, %s1968_s28   ;;  %s1469_s27 = sphi %s1559_s27, %s1967_s27   ;;  %s1465_s26 = sphi %s1557_s26, %s1966_s26   ;;  %s1461_s25 = sphi %s1555_s25, %s1965_s25   ;;  %s1457_s24 = sphi %s1553_s24, %s1962_s24  }
  0x15   : > { %1922 = sst [smem:[#allocation20_spill]] %s1481_s30  ;;  %p946_p0 = scmp.ge.s32.totalorder %s1497_s11, 1 }
  0x16   : > { %1923 = sst [smem:[#allocation21_spill]] %s1485_s8  ;;  %p1910_p1 = scmp.eq.s32.totalorder %s1609_s12, 0 }
  0x17   : > { %p234_p2 = scmp.lt.s32.totalorder %s1497_s11, 9  ;;  %s1499_s14 = smov [#allocation10]  }
  0x18   : > { %s246_s15 = sshll.u32 %s1499_s14, 4  ;;  %s247_s15 = int_to_ptr.vmem [resolvable:$true] %s246_s15 }
  0x19   : > { %p1614_p3 = pnand %p946_p0, %p234_p2  ;;  %s1240_s17 = scalar_lea.vmem %s247_s15, 1024 }
  0x1a   : > { %p1241_p7 = scmp.ne.s32.totalorder %s247_s15, %s1240_s17  ;;  %p1248_p10 = scmp.lt.s32.totalorder %s247_s15, %s247_s15 }
  0x1b   : > { %s1924_s13 = scalar_select %p1614_p3, 1, 0 }
  0x1c   : > { %p1080_p4 = pneg %p1614_p3  ;;  %p1249_p11 = scmp.lt.s32.totalorder %s1240_s17, %s1240_s17 }
  0x1d   : > { %1925 = sst [smem:[#allocation22_spill]] %s1924_s13 }
  0x1e   : > { %p1622_p5 = pnand %p1080_p4, %p1910_p1  ;;  %p1250_p12 = por %p1249_p11, %p1248_p10 }
  0x20   : > { %p1231_p6 = pneg %p1622_p5 }
  0x22   : > { %p1243_p8 = pnand %p1241_p7, %p1231_p6 }
  0x24   : > { %p1244_p9 = pneg %p1243_p8 }
  0x26   : > { %p1251_p13 = pnand %p1250_p12, %p1244_p9 }
  0x28   : > { %1254 = shalt.err (!%p1251_p13)
}
  0x29   : > { %s1900_s18 = smov 64   ;;  %s1901_s19 = smov 4  }
  0x2a   : > { %s1927_s3 = sld [smem:[#allocation28_spill]]  ;;  %s36_s22 = sadd.s32 1, %s1489_s9 }
  0x2b   : > { %p37_p0 = scmp.ge.s32.totalorder %s36_s22, 4  ;;  %s39_s23 = sadd.s32 1, %s1493_s10 }
  0x2c   : > { %p1911_p2 = scmp.eq.s32.totalorder %s1497_s11, 0  ;;  %s74_s14 = sadd.s32 1, %s1465_s26 }
  0x2d   : > { %s1975_s22 = smov (%p37_p0, %s36_s22), 0  ;;  %s1977_s23 = smov (!%p37_p0, %s39_s23), %s1493_s10 }
  0x2e   : > { %1928 = sst [smem:[#allocation23_spill]] %s1975_s22  ;;  %s70_s17 = ssub.s32 %s1489_s9, %s1975_s22 }
  0x2f   : > { %p81_p4 = scmp.ne.s32.totalorder %s1465_s26, %s1461_s25  ;;  %p41_p7 = scmp.ge.s32.totalorder %s1977_s23, 2 }
  0x30   : > { %1083 = dma.hbm_to_vmem [thread:$0]  (!%p1622_p5), %s1927_s3, 1024, %s247_s15, [#allocation11], %s1900_s18, %s1900_s18, %s1901_s19  }
  0x31   : > { %p87_p8 = scmp.ne.s32.totalorder %s1461_s25, %s1457_s24  ;;  %p1654_p9 = por %p81_p4, %p1911_p2 }
  0x32   : > { %p1909_p10 = scmp.lt.s32.totalorder %s1497_s11, 8  ;;  %s1979_s23 = smov (%p41_p7, %s1977_s23), 0 }
  0x33   : > { %1930 = sst [smem:[#allocation24_spill]] %s1979_s23  ;;  %p1663_p11 = por %p87_p8, %p1910_p1 }
  0x34   : > { %s297_s21 = sand.u32 1, %s1497_s11   ;;  %s1670_s18 = ssub.s32 %s1493_s10, %s1979_s23 }
  0x35   : > { %s1931_s20 = scalar_select %p1663_p11, 1, 0 }
  0x36   : > { %s71_s24 = sor.u32 %s70_s17, %s1670_s18  ;;  %s299_s19 = sand.u32 1, %s1465_s26  }
  0x37   : > { %1932 = sst [smem:[#allocation25_spill]] %s1931_s20  ;;  %p72_p13 = scmp.eq.s32.totalorder %s71_s24, 0 }
  0x38   : > { %s952_s3 = sshll.u32 %s299_s19, 2  ;;  %s953_s22 = sshll.u32 %s1493_s10, 2 }
  0x39   : > { %s1677_s7 = scalar_select %p72_p13, %s1465_s26, %s74_s14  }
  0x3a   : > { %s306_s8 = sadd.s32 %s1489_s9, %s953_s22  ;;  %s301_s4 = scalar_lea.vmem [#allocation7], %s952_s3 }
  0x3b   : > { %s954_s6 = sshll.u32 %s306_s8, 6  ;;  %s310_s30 = sshll.u32 %s301_s4, 4  ;;  %s311_s30 = int_to_ptr.vmem [resolvable:$true] %s310_s30 }
  0x3c   : > { %s1933_s1 = sld [smem:[#allocation27_spill]]  ;;  %p1687_p0 = pnand %p1909_p10, %p1654_p9 }
  0x3d   : > { %s1502_s19 = smov [#allocation12]   ;;  %s1693_s22 = scalar_lea.sflag [#allocation8], %s297_s21 }
  0x3e   : > { %s262_s17 = sshll.u32 %s1502_s19, 4  ;;  %p1257_p4 = pneg %p1687_p0  ;;  %s1691_s17 = int_to_ptr.vmem [resolvable:$true] %s262_s17 }
  0x3f   : > { %s1268_s3 = scalar_lea.vmem %s311_s30, 64  ;;  %s1503_s4 = smov [#allocation7]  }
  0x40   : > { %p1269_p7 = scmp.ne.s32.totalorder %s311_s30, %s1268_s3 }
  0x42   : > { %s308_s13 = scalar_lea.hbm %s1933_s1, %s954_s6  ;;  %p1271_p8 = pnand %p1269_p7, %p1257_p4 }
  0x43   : > { %s1273_s6 = sshll.u32 %s1503_s4, 4  ;;  %s1274_s6 = int_to_ptr.vmem [resolvable:$false] %s1273_s6 }
  0x44   : > { %p1272_p13 = pneg %p1271_p8  ;;  %s1275_s25 = scalar_lea.vmem %s1274_s6, 128 }
  0x45   : > { %p1276_p9 = scmp.lt.s32.totalorder %s311_s30, %s1274_s6  ;;  %p1277_p10 = scmp.lt.s32.totalorder %s1275_s25, %s1268_s3 }
  0x47   : > { %p1278_p1 = por %p1277_p10, %p1276_p9 }
  0x49   : > { %p1279_p2 = pnand %p1278_p1, %p1272_p13 }
  0x4b   : > { %1282 = shalt.err (!%p1279_p2)
}
  0x4c   : > { %1093 = dma.hbm_to_vmem [thread:$0]  (!%p1687_p0), %s308_s13, 64, %s311_s30, %s1693_s22  }
  0x4d   : > { %s1294_s8 = scalar_lea.vmem %s1691_s17, 1024  ;;  %p1302_p12 = scmp.lt.s32.totalorder %s1691_s17, %s1691_s17 }
  0x4e   : > { %p1295_p4 = scmp.ne.s32.totalorder %s1691_s17, %s1294_s8  ;;  %p1303_p11 = scmp.lt.s32.totalorder %s1294_s8, %s1294_s8 }
  0x50   : > { %p1297_p7 = pnand %p1295_p4, %p1231_p6  ;;  %p1304_p10 = por %p1303_p11, %p1302_p12 }
  0x52   : > { %p1298_p8 = pneg %p1297_p7 }
  0x54   : > { %p1305_p1 = pnand %p1304_p10, %p1298_p8 }
  0x56   : > { %1308 = shalt.err (!%p1305_p1)
}
  0x57   : > { %s1935_s23 = smov 4   ;;  %s1936_s14 = smov 64  }
  0x58   : > { %s1937_s5 = sld [smem:[#allocation30_spill]]  ;;  %s945_s13 = sadd.s32 4294967294, %s1497_s11  }
  0x59   : > { %s46_s16 = sadd.s32 1, %s1477_s29  ;;  %p53_p6 = scmp.ne.s32.totalorder %s1477_s29, %s1473_s28 }
  0x5a   : > { %p1938_p2 = scmp.eq.s32.totalorder %s1670_s18, 0  ;;  %p1939_p11 = scmp.eq.s32.totalorder %s1497_s11, 0 }
  0x5b   : > { %p59_p0 = scmp.ne.s32.totalorder %s1473_s28, %s1469_s27  ;;  %p221_p13 = scmp.eq.s32.totalorder %s1609_s12, 7 }
  0x5c   : > { %s1723_s20 = scalar_select %p1938_p2, %s1477_s29, %s46_s16  }
  0x5d   : > { %p1727_p12 = por %p1939_p11, %p53_p6  ;;  %p227_p9 = scmp.eq.s32.totalorder %s945_s13, 7 }
  0x5e   : > { %1086 = dma.hbm_to_vmem [thread:$0]  (!%p1622_p5), %s1937_s5, 1024, %s1691_s17, [#allocation11], %s1936_s14, %s1936_s14, %s1935_s23  }
  0x5f   : > { %p1941_p4 = scmp.eq.s32.totalorder %s1609_s12, 0  ;;  %s279_s19 = sand.u32 1, %s1477_s29  }
  0x60   : > { %p1741_p5 = por %p221_p13, %p53_p6  ;;  %p1745_p8 = por %p227_p9, %p59_p0 }
  0x61   : > { %p1736_p7 = por %p1941_p4, %p59_p0  ;;  %s950_s3 = sshll.u32 %s279_s19, 3 }
  0x62   : > { %s1943_s18 = scalar_select %p1741_p5, 1, 0 }
  0x63   : > { %s1944_s17 = scalar_select %p1745_p8, 1, 0 }
  0x64   : > { %s951_s4 = sshll.u32 %s1493_s10, 7  ;;  %s1945_s0 = sld [smem:[#allocation26_spill]] }
  0x65   : > { %s283_s23 = scalar_lea.vmem [#allocation4], %s950_s3  ;;  %p1946_p10 = scmp.lt.s32.totalorder %s1497_s11, 8 }
  0x66   : > { %s290_s14 = sshll.u32 %s283_s23, 4  ;;  %s1764_s16 = scalar_lea.hbm %s1894_s2, %s951_s4  ;;  %s291_s14 = int_to_ptr.vmem [resolvable:$true] %s290_s14 }
  0x67   : > { %p1757_p1 = pnand %p1946_p10, %p1727_p12  ;;  %s321_s1 = scalar_lea.vmem [#allocation9], %s950_s3 }
  0x68   : > { %s328_s5 = sshll.u32 %s321_s1, 4  ;;  %s280_s6 = scalar_lea.sflag [#allocation5], %s279_s19  ;;  %s329_s5 = int_to_ptr.vmem [resolvable:$true] %s328_s5 }
  0x69   : > { %p1311_p6 = pneg %p1757_p1  ;;  %s1322_s25 = scalar_lea.vmem %s291_s14, 128 }
  0x6a   : > { %s288_s8 = scalar_lea.hbm %s1945_s0, %s951_s4  ;;  %p1323_p2 = scmp.ne.s32.totalorder %s291_s14, %s1322_s25 }
  0x6b   : > { %s1504_s21 = smov [#allocation4]  }
  0x6c   : > { %p1325_p11 = pnand %p1323_p2, %p1311_p6  ;;  %s1327_s23 = sshll.u32 %s1504_s21, 4  ;;  %s1328_s23 = int_to_ptr.vmem [resolvable:$false] %s1327_s23 }
  0x6d   : > { %s1329_s0 = scalar_lea.vmem %s1328_s23, 256  ;;  %p1330_p0 = scmp.lt.s32.totalorder %s291_s14, %s1328_s23 }
  0x6e   : > { %p1326_p12 = pneg %p1325_p11  ;;  %p1331_p13 = scmp.lt.s32.totalorder %s1329_s0, %s1322_s25 }
  0x70   : > { %p1332_p9 = por %p1331_p13, %p1330_p0 }
  0x72   : > { %p1333_p4 = pnand %p1332_p9, %p1326_p12 }
  0x74   : > { %1336 = shalt.err (!%p1333_p4)
}
  0x75   : > { %1090 = dma.hbm_to_vmem [thread:$0]  (!%p1757_p1), %s288_s8, 128, %s291_s14, %s280_s6  }
  0x76   : > { %s1350_s1 = scalar_lea.vmem %s329_s5, 128  ;;  %s1505_s19 = smov [#allocation9]  }
  0x77   : > { %p1351_p10 = scmp.ne.s32.totalorder %s329_s5, %s1350_s1  ;;  %s1355_s3 = sshll.u32 %s1505_s19, 4  ;;  %s1356_s3 = int_to_ptr.vmem [resolvable:$false] %s1355_s3 }
  0x78   : > { %s1357_s4 = scalar_lea.vmem %s1356_s3, 256  ;;  %p1358_p8 = scmp.lt.s32.totalorder %s329_s5, %s1356_s3 }
  0x79   : > { %p1353_p2 = pnand %p1351_p10, %p1311_p6  ;;  %p1359_p5 = scmp.lt.s32.totalorder %s1357_s4, %s1350_s1 }
  0x7b   : > { %p1354_p11 = pneg %p1353_p2  ;;  %p1360_p0 = por %p1359_p5, %p1358_p8 }
  0x7d   : > { %p1361_p12 = pnand %p1360_p0, %p1354_p11 }
  0x7f   : > { %1364 = shalt.err (!%p1361_p12)
}
  0x80   : > { %1096 = dma.hbm_to_vmem [thread:$0]  (!%p1757_p1), %s1764_s16, 128, %s329_s5, %s1693_s22  }
  0x81   : > { %337 = sbr.rel (%p1614_p3) target bundleno = 1640 (0x668), region = 48  ;;  %s1783_s8 = sand.u32 (!%p1614_p3), 1, %s1473_s28  }
  0x82   : > { %s1786_s14 = sshll.u32 (!%p1614_p3), %s1783_s8, 3  ;;  %s340_s30 = scalar_lea.sflag (!%p1614_p3), [#allocation5], %s1783_s8 }
  0x83   : > { %s343_s13 = scalar_lea.vmem (!%p1614_p3), [#allocation4], %s1786_s14 }
  0x86   : > { %1436 = dma.done.wait (%p1736_p7), %s340_s30, 128  }
  0x87   : > { %1438 = vsyncadd (%p1736_p7), %s340_s30, 4294967168  ;;  %s1949_s5 = sld [smem:[#allocation19_spill]]  ;;  %s348_s15 = sand.u32 1, %s1609_s12  }
  0x88   : > { %s1950_s22 = sld [smem:[#allocation25_spill]]  ;;  %s349_s25 = scalar_lea.sflag [#allocation8], %s348_s15 }
  0x8d   : > { %s350_s16 = sand.u32 1, %s1949_s5  }
  0x8e   : > { %s1796_s6 = sshll.u32 %s350_s16, 2  ;;  %p1951_p3 = scmp.ne.s32.totalorder %s1950_s22, 0 }
  0x8f   : > { %s352_s21 = scalar_lea.vmem [#allocation7], %s1796_s6 }
  0x90   : > { %1440 = dma.done.wait (%p1951_p3), %s349_s25, 64  }
  0x91   : > { %1442 = vsyncadd (%p1951_p3), %s349_s25, 4294967232  ;;  %s361_s23 = scalar_lea.vmem [#allocation9], %s1786_s14 }
  0x92   : > { %1444 = dma.done.wait (%p1736_p7), %s349_s25, 128  }
  0x93   : > { %1446 = vsyncadd (%p1736_p7), %s349_s25, 4294967168  ;;  %p1952_p5 = scmp.eq.s32.totalorder %s1609_s12, 0 }
  0x95   : > { %1448 = dma.done.wait (%p1952_p5), [#allocation11], 2048   ;;  %p1953_p8 = pmov %p1952_p5 }
  0x96   : > { %s409_s1 = scalar_lea.vmem [#allocation13], %s1786_s14  ;;  %s1954_s19 = sld [smem:[#allocation20_spill]] }
  0x97   : > { %1450 = vsyncadd (%p1953_p8), [#allocation11], 4294965248 }
  0x9c   : > { %p964_p1 = scmp.ne.s32.totalorder %s1954_s19, 0 }
  0x9d   : > { %s1955_s3 = sld [smem:[#allocation29_spill]] (!%p964_p1) }
  0x9e   : > { %414 = sbr.rel (%p964_p1) target bundleno = 395 (0x18b), region = 72 }
  0xa3   : > { %v1205_v0 = vld [vmem:[#allocation10 + $0x38] sm:$0xff]   ;;  %v1506_v1 = vmov 0.0   ;;  %v1206_v2 = vld [vmem:[#allocation10 + $0x30] sm:$0xff]   ;;  %vm1507_vm0 = vmmov 0   ;;  %v1207_v3 = vld [vmem:[#allocation10 + $0x28] sm:$0xff]  }
  0xa4   : > { %1012 = vmatprep.subr.bf16.mxu0 %v1506_v1  ;;  %531 = vst [vmem:[#allocation3] sm:$0xff] %v1506_v1  ;;  %1028 = vmatprep.mubr.msk.bf16.mxu0 %vm1507_vm0, %v1506_v1  ;;  %v1208_v4 = vld [vmem:[#allocation10 + $0x20] sm:$0xff]   ;;  %v1209_v5 = vld [vmem:[#allocation10 + $0x18] sm:$0xff]   ;;  %v1210_v6 = vld [vmem:[#allocation10 + $0x10] sm:$0xff]  }
  0xa5   : > { %1013 = vmatpush3.bf16.msra.mxu0 %v1205_v0  ;;  %v1211_v7 = vld [vmem:[#allocation10 + $0x8] sm:$0xff]   ;;  %v1212_v8 = vld [vmem:[#allocation10] sm:$0xff]   ;;  %v528_v13 = vld [vmem:[%s361_s23] sm:$0xff] }
  0xa6   : > { %1014 = vmatprep.subr.bf16.mxu0 %v1506_v1  ;;  %v415_v9 = vld [vmem:[%s343_s13] sm:$0xff]  ;;  %v965_v11 = vld [vmem:[%s1955_s3] ss:$0 sm:$0xff] }
  0xa7   : > { %v416_v10 = vpack.c.bf16 %v415_v9, %v415_v9 }
  0xa9   : > { %1015 = vmatpush3.bf16.msra.mxu0 %v1206_v2 }
  0xaa   : > { %1016 = vmatprep.subr.bf16.mxu0 %v1506_v1 }
  0xad   : > { %1017 = vmatpush3.bf16.msra.mxu0 %v1207_v3 }
  0xae   : > { %1018 = vmatprep.subr.bf16.mxu0 %v1506_v1 }
  0xb1   : > { %1019 = vmatpush3.bf16.msra.mxu0 %v1208_v4 }
  0xb2   : > { %1020 = vmatprep.subr.bf16.mxu0 %v1506_v1 }
  0xb5   : > { %1021 = vmatpush3.bf16.msra.mxu0 %v1209_v5 }
  0xb6   : > { %1022 = vmatprep.subr.bf16.mxu0 %v1506_v1 }
  0xb9   : > { %1023 = vmatpush3.bf16.msra.mxu0 %v1210_v6 }
  0xba   : > { %1024 = vmatprep.subr.bf16.mxu0 %v1506_v1 }
  0xbd   : > { %1025 = vmatpush3.bf16.msra.mxu0 %v1211_v7 }
  0xbe   : > { %1026 = vmatprep.subr.bf16.mxu0 %v1506_v1 }
  0xc1   : > { %1027 = vmatpush3.bf16.msra.mxu0 %v1212_v8 }
  0xc4   : > { %1029 = vmatmul.mubr.bf16.vlgmr.msra.gmra.mxu0 %v416_v10 }
 0x184   : > { %v522_v12 = vpop.f32.mrf.mxu0 }
 0x185   : > { %v523_v14 = vadd.f32 %v965_v11, %v522_v12 }
 0x186   : > { %v1030_v15 = vpop.f32.mrf.mxu0 }
 0x187   : > { %v529_v16 = vadd.f32 %v528_v13, %v523_v14 }
 0x188   : > { %v525_v17 = vpop.f32.mrf.mxu0 }
 0x189   : > { %530 = vst [vmem:[#allocation2] sm:$0xff] %v529_v16 }
 0x18a   : > { %v1031_v18 = vpop.f32.mrf.mxu0 }
 0x18b PF: > { %v1213_v19 = vld [vmem:[#allocation12 + $0x38] sm:$0xff]   ;;  %v1508_v20 = vmov 0.0   ;;  %v1214_v21 = vld [vmem:[#allocation12 + $0x30] sm:$0xff]   ;;  %vm1509_vm1 = vmmov 0   ;;  %v1215_v22 = vld [vmem:[#allocation12 + $0x28] sm:$0xff]   ;;  %s1956_s30 = sld [smem:[#allocation31_spill]] }
 0x18c   : > { %1032 = vmatprep.subr.bf16.mxu0 %v1508_v20  ;;  %1052 = vmatprep.subr.bf16.mxu1 %v1508_v20  ;;  %v1216_v23 = vld [vmem:[#allocation12 + $0x20] sm:$0xff]   ;;  %v1217_v24 = vld [vmem:[#allocation12 + $0x18] sm:$0xff]   ;;  %v1218_v25 = vld [vmem:[#allocation12 + $0x10] sm:$0xff]   ;;  %vm687_vm2 = vcmask 31744   ;;  %vm699_vm3 = vcmask 64544   ;;  %s1510_s13 = smov 124  }
 0x18d   : > { %1033 = vmatpush3.bf16.msra.mxu0 %v1213_v19  ;;  %1048 = vmatprep.mubr.msk.bf16.mxu0 %vm1509_vm1, %v1508_v20  ;;  %v1219_v26 = vld [vmem:[#allocation12 + $0x8] sm:$0xff]   ;;  %v1220_v27 = vld [vmem:[#allocation12] sm:$0xff]   ;;  %vm733_vm4 = vcmask 1041408   ;;  %s1511_s5 = smov 4   ;;  %v726_v4 = vld [vmem:[#allocation3] sm:$0xff]  ;;  %s1957_s22 = sld [smem:[#allocation20_spill]] }
 0x18e   : > { %1034 = vmatprep.subr.bf16.mxu0 %v1508_v20  ;;  %1054 = vmatprep.mubr.msk.bf16.mxu1 %vm1509_vm1, %v1508_v20  ;;  %v532_v28 = vld [vmem:[%s352_s21] sm:$0xf] }
 0x18f   : > { %v983_v56 = vrot.slane %v532_v28, 10 }
 0x190   : > { %v644_v35 = vld [vmem:[#allocation2] sm:$0xff] }
 0x191   : > { %1035 = vmatpush3.bf16.msra.mxu0 %v1214_v21  ;;  %v974_v29 = vld [vmem:[%s1956_s30] ss:$0 sm:$0xff]  ;;  %v645_v37 = vpack.c.bf16 %v644_v35, %v644_v35  ;;  %v725_v57 = vadd.bf16 %v983_v56, %v532_v28 }
 0x192   : > { %1036 = vmatprep.subr.bf16.mxu0 %v1508_v20 }
 0x193   : > { %v735_v58 = vsel %vm733_vm4, %v725_v57, 0  ;;  %p985_p7 = scmp.ne.s32.totalorder %s1957_s22, 3 }
 0x195   : > { %1037 = vmatpush3.bf16.msra.mxu0 %v1215_v22 }
 0x196   : > { %1038 = vmatprep.subr.bf16.mxu0 %v1508_v20 }
 0x199   : > { %1039 = vmatpush3.bf16.msra.mxu0 %v1216_v23 }
 0x19a   : > { %1040 = vmatprep.subr.bf16.mxu0 %v1508_v20 }
 0x19d   : > { %1041 = vmatpush3.bf16.msra.mxu0 %v1217_v24 }
 0x19e   : > { %1042 = vmatprep.subr.bf16.mxu0 %v1508_v20 }
 0x1a1   : > { %1043 = vmatpush3.bf16.msra.mxu0 %v1218_v25 }
 0x1a2   : > { %1044 = vmatprep.subr.bf16.mxu0 %v1508_v20 }
 0x1a5   : > { %1045 = vmatpush3.bf16.msra.mxu0 %v1219_v26 }
 0x1a6   : > { %1046 = vmatprep.subr.bf16.mxu0 %v1508_v20 }
 0x1a9   : > { %1047 = vmatpush3.bf16.msra.mxu0 %v1220_v27 }
 0x1ac   : > { %1049 = vmatmul.mubr.bf16.vlgmr.msra.gmra.mxu0 %v532_v28 }
 0x26c   : > { %v638_v30 = vpop.f32.mrf.mxu0 }
 0x26d   : > { %v639_v31 = vadd.f32 %v974_v29, %v638_v30 }
 0x26e   : > { %v1050_v32 = vpop.f32.mrf.mxu0 }
 0x26f   : > { %v646_v33 = vpack.c.bf16 %v639_v31, %v639_v31 }
 0x270   : > { %v641_v34 = vpop.f32.mrf.mxu0 }
 0x271   : > { %1053 = vmatpush3.bf16.xpose.msra.mxu1 %v646_v33 }
 0x272   : > { %v1051_v36 = vpop.f32.mrf.mxu0  ;;  %1058 = vmatprep.subr.bf16.mxu1 %v1508_v20 }
 0x278   : > { %1055 = vmatmul.mubr.bf16.vlgmr.msra.gmra.mxu1 %v645_v37 }
 0x279   : > { %1060 = vmatprep.mubr.msk.bf16.mxu1 %vm1509_vm1, %v1508_v20  ;;  %1059 = vmatpush3.bf16.msra.mxu1 %v735_v58 }
 0x338   : > { %v681_v38 = vpop.f32.mrf.mxu1 }
 0x339   : > { %v688_v39 = vsel %vm687_vm2, %v681_v38, -inf  ;;  %v700_v42 = vsel %vm699_vm3, %v681_v38, -inf }
 0x33a   : > { %689 = vmax.xlane.f32.xlu0 %v688_v39  ;;  %v1056_v40 = vpop.f32.mrf.mxu1 }
 0x33c   : > { %v684_v41 = vpop.f32.mrf.mxu1 }
 0x33e   : > { %701 = vmax.xlane.f32.xlu0 %v700_v42  ;;  %v1057_v43 = vpop.f32.mrf.mxu1 }
 0x3c3   : > { %v690_v44 = vpop.xlane.xlu0 %689 }
 0x3c4   : > { %v691_v49 = vsub.f32 %v681_v38, %v690_v44 }
 0x3c6   : > { %v692_v50 = vmul.f32 1.442695, %v691_v49 }
 0x3c7   : > { %v702_v45 = vpop.xlane.xlu0 %701 }
 0x3c8   : > { %v703_v46 = vsub.f32 %v681_v38, %v702_v45 }
 0x3ca   : > { %v704_v47 = vmul.f32 1.442695, %v703_v46 }
 0x3cc   : > { %1221 = vpow2.f32 %v704_v47 }
 0x3cd   : > { %1223 = vpow2.f32 %v692_v50 }
 0x3d9   : > { %v1222_v48 = vpop.eup %1221 }
 0x3da   : > { %707 = vrot.lane.b32.xlu1 %v1222_v48, %s1510_s13  ;;  %v1224_v51 = vpop.eup %1223 }
 0x3db   : > { %v694_v52 = vsel %vm687_vm2, %v1224_v51, 0.0 }
 0x3fe   : > { %695 = vadd.xlane.f32.xlu1 %v694_v52 }
 0x44c   : > { %v708_v53 = vpop.permute.xlu1 %707 }
 0x44d   : > { %v710_v54 = vsel %vm687_vm2, %v708_v53, 0.0 }
 0x44e   : > { %711 = vadd.xlane.f32.xlu0 %v710_v54 }
 0x487   : > { %v696_v55 = vpop.xlane.xlu1 %695 }
 0x488   : > { %1225 = vrcp.f32 %v696_v55 }
 0x495   : > { %v1226_v59 = vpop.eup %1225 }
 0x496   : > { %v698_v60 = vmul.f32 %v1226_v59, %v1224_v51 }
 0x498   : > { %716 = vrot.lane.b32.xlu0 %v698_v60, %s1511_s5 }
 0x4d7   : > { %v712_v61 = vpop.xlane.xlu0 %711 }
 0x4d8   : > { %1227 = vrcp.f32 %v712_v61 }
 0x4e5   : > { %v1228_v62 = vpop.eup %1227 }
 0x4e6   : > { %v714_v63 = vmul.f32 %v1228_v62, %v1222_v48 }
 0x50a   : > { %v717_v0 = vpop.permute.xlu0 %716 }
 0x50b   : > { %v719_v1 = vadd.f32 %v717_v0, %v714_v63 }
 0x50d   : > { %v720_v2 = vpack.c.bf16 %v719_v1, %v719_v1 }
 0x50f   : > { %728 = vrot.lane.b32.xlu0 %v720_v2, %s1510_s13 }
 0x581   : > { %v729_v3 = vpop.permute.xlu0 %728 }
 0x582   : > { %1061 = vmatmul.mubr.msk.bf16.vlgmr.msra.gmra.mxu1 %vm687_vm2, %v729_v3 }
 0x642   : > { %v771_v5 = vpop.f32.mrf.mxu1 }
 0x643   : > { %v777_v6 = vadd.f32 %v771_v5, %v726_v4 }
 0x644   : > { %v1062_v7 = vpop.f32.mrf.mxu1  ;;  %782 = sbr.rel (%p985_p7) target bundleno = 1614 (0x64e), region = 76 }
 0x645   : > { %778 = vst [vmem:[#allocation3] sm:$0xff] %v777_v6 }
 0x646   : > { %v774_v8 = vpop.f32.mrf.mxu1 }
 0x648   : > { %v1063_v9 = vpop.f32.mrf.mxu1 }
 0x64c   : > { %v783_v10 = vld [vmem:[#allocation3] sm:$0xff] }
 0x64d   : > { %784 = vst [vmem:[%s409_s1] sm:$0xff] %v783_v10 }
 0x64e PF: > { %s1958_s15 = sld [smem:[#allocation21_spill]]  ;;  %s799_s19 = sshll.u32 %s409_s1, 4  ;;  %s800_s19 = int_to_ptr.vmem [resolvable:$true] %s799_s19 }
 0x64f   : > { %s1959_s21 = sld [smem:[#allocation32_spill]]  ;;  %s786_s12 = scalar_lea.sflag [#allocation6], %s1783_s8 }
 0x650   : > { %s1365_s24 = scalar_lea.vmem %s800_s19, 128  ;;  %p1960_p13 = scmp.ne.s32.totalorder %s1943_s18, 0 }
 0x651   : > { %p1366_p6 = scmp.ne.s32.totalorder %s800_s19, %s1365_s24  ;;  %s1512_s3 = smov [#allocation13]  }
 0x652   : > { %s1369_s4 = sshll.u32 %s1512_s3, 4  ;;  %s1370_s4 = int_to_ptr.vmem [resolvable:$false] %s1369_s4 }
 0x653   : > { %p1367_p9 = pnand %p1366_p6, %p1960_p13  ;;  %s1371_s0 = scalar_lea.vmem %s1370_s4, 256 }
 0x654   : > { %s987_s16 = sshll.u32 %s1958_s15, 7  ;;  %p1372_p10 = scmp.lt.s32.totalorder %s800_s19, %s1370_s4 }
 0x655   : > { %s797_s23 = scalar_lea.hbm %s1959_s21, %s987_s16  ;;  %p1368_p4 = pneg %p1367_p9 }
 0x656   : > { %p1373_p2 = scmp.lt.s32.totalorder %s1371_s0, %s1365_s24 }
 0x658   : > { %p1374_p11 = por %p1373_p2, %p1372_p10 }
 0x65a   : > { %p1375_p0 = pnand %p1374_p11, %p1368_p4 }
 0x65c   : > { %1378 = shalt.err (!%p1375_p0)
}
 0x65d   : > { %s1379_s30 = scalar_lea.hbm %s797_s23, 128  ;;  %s1383_s1 = scalar_lea.hbm %s1959_s21, 256 }
 0x65e   : > { %p1380_p12 = scmp.ne.s32.totalorder %s797_s23, %s1379_s30  ;;  %p1384_p8 = scmp.lt.s32.totalorder %s797_s23, %s1959_s21 }
 0x65f   : > { %p1385_p1 = scmp.lt.s32.totalorder %s1383_s1, %s1379_s30 }
 0x660   : > { %p1381_p3 = pnand %p1380_p12, %p1960_p13 }
 0x661   : > { %p1386_p7 = por %p1385_p1, %p1384_p8 }
 0x662   : > { %p1382_p5 = pneg %p1381_p3 }
 0x664   : > { %p1387_p6 = pnand %p1386_p7, %p1382_p5 }
 0x666   : > { %1390 = shalt.err (!%p1387_p6)
}
 0x667   : > { %1078 = dma.vmem_to_hbm [thread:$0]  (%p1960_p13), %s800_s19, 128, %s797_s23, %s786_s12  }
 0x668 PF: > { %p1106_p9 = scmp.ge.s32.totalorder %s1497_s11, 2  ;;  %s811_s22 = sand.u32 1, %s1469_s27  }
 0x669   : > { %p1961_p4 = scmp.ne.s32.totalorder %s1944_s17, 0  ;;  %s812_s15 = scalar_lea.sflag [#allocation6], %s811_s22 }
 0x66b   : > { %p1098_p10 = pnand %p1106_p9, %p1961_p4 }
 0x66d   : > { %p1099_p2 = pneg %p1098_p10 }
 0x66f   : > { %1452 = dma.done.wait (%p1099_p2), %s812_s15, 128  }
 0x670   : > { %1454 = vsyncadd (%p1099_p2), %s812_s15, 4294967168  ;;  %s27_s11 = sadd.s32 1, %s1497_s11   ;;  %s1962_s24 = sld [smem:[#allocation19_spill]] }
 0x671   : > { %p24_p11 = scmp.ge.s32.totalorder %s27_s11, 10   ;;  %s1963_s18 = sld [smem:[#allocation23_spill]] }
 0x672   : > { %s1964_s16 = sld [smem:[#allocation24_spill]]  ;;  %s1965_s25 = smov %s1465_s26 }
 0x673   : > { %s1966_s26 = smov %s1677_s7  ;;  %s1967_s27 = smov %s1473_s28 }
 0x674   : > { %s1968_s28 = smov %s1477_s29  ;;  %s1969_s29 = smov %s1723_s20 }
 0x675   : > { %s1970_s30 = smov %s1489_s9  ;;  %s1971_s8 = smov %s1493_s10 }
 0x676   :  { %26 = sbr.rel (!%p24_p11) target bundleno = 20 (0x14), region = 133 }
 0x677   : > { %s1972_s9 = smov %s1963_s18 }
 0x678   : > { %s1973_s10 = smov %s1964_s16 }
 0x67b   :  { %817 = vsyncpa [#allocation5], 1 }
 0x67c   :  { %819 = vsyncpa [#allocation5 + $0x1], 1 }
 0x67d   :  { %820 = vsyncpa [#allocation8], 1 }
 0x67e   :  { %822 = vsyncpa [#allocation8 + $0x1], 1 }
 0x67f   :  { %823 = vsyncpa [#allocation11], 1 }
 0x680   :  { %824 = vsyncpa [#allocation6], 1 }
 0x681   :  { %826 = vsyncpa [#allocation6 + $0x1], 1 }

</bundles_post_ra>
